<compile_context>
chip_gen: v7x
topology: tpu7x:2x2x1
jax: 0.10.0
libtpu: 0.0.40
codegen_flags: <defaults>
</compile_context>

<pallas_src>
import functools

import jax
import jax.numpy as jnp
from jax import lax
from jax.experimental import pallas as pl
from jax.experimental.pallas import tpu as pltpu

_NEG_BIG = -1e30  # finite "minus infinity" (avoids -inf - -inf -> NaN)


def _round_up(x, m):
    return ((x + m - 1) // m) * m


def _focal_from_logpb(logpb, t, *, gamma, alpha, ignore_index):
    """Shared focal epilogue: logpb (log p_target, clamped <= 0) -> per-row loss."""
    pb = jnp.exp(logpb)
    if gamma == 0.0:                       # plain cross-entropy specialization
        loss = -logpb
    elif gamma == 1.0:
        loss = -(1.0 - pb) * logpb
    elif gamma == 2.0:
        w = 1.0 - pb
        loss = -(w * w) * logpb
    else:
        base = jnp.maximum(1.0 - pb, 0.0)  # NaN-safe base for fractional gamma
        loss = -jnp.power(base, gamma) * logpb
    # ignore_index (and padded) rows -> exactly zero loss (matches torch's
    # zeros-init + masked scatter).  Must stay AFTER the target gather.
    loss = jnp.where(t != ignore_index, loss, 0.0)
    if alpha is not None:
        loss = loss * jnp.where(t == 0, 1.0 - alpha, alpha)
    return loss


def _focal_kernel(x_ref, t_ref, o_ref, *, gamma, alpha, ignore_index):
    """Single row-grid axis: each block covers the full class dim."""
    x = x_ref[...].astype(jnp.float32)                       # (TN, C)
    t = t_ref[...]                                           # (TN, 1) int32

    # Numerically stable log-sum-exp over the class (lane) axis.
    m = jnp.max(x, axis=-1, keepdims=True)                   # (TN, 1)
    lse = jnp.log(jnp.sum(jnp.exp(x - m), axis=-1, keepdims=True)) + m

    # Gather the target-class logit with a (1, C) lane iota (no full (TN, C)
    # int32 tile, and no full log-softmax tile).
    col = lax.broadcasted_iota(jnp.int32, (1, x.shape[-1]), 1)
    onehot = col == t                                        # (TN, C) bool
    x_t = jnp.sum(jnp.where(onehot, x, 0.0), axis=-1, keepdims=True)

    logpb = jnp.minimum(x_t - lse, 0.0)                      # log p_target <= 0
    o_ref[...] = _focal_from_logpb(logpb, t, gamma=gamma, alpha=alpha,
                                   ignore_index=ignore_index)


def _focal_kernel_ctiled(x_ref, t_ref, o_ref, m_sc, s_sc, xt_sc, *,
                         gamma, alpha, ignore_index, n_classes, tile_c):
    """Two grid axes (rows 'parallel', classes 'arbitrary'): online softmax."""
    j = pl.program_id(1)

    @pl.when(j == 0)
    def _():
        m_sc[...] = jnp.full_like(m_sc, _NEG_BIG)
        s_sc[...] = jnp.zeros_like(s_sc)
        xt_sc[...] = jnp.zeros_like(xt_sc)

    x = x_ref[...].astype(jnp.float32)                       # (TN, TC)
    t = t_ref[...]                                           # (TN, 1) int32

    col = lax.broadcasted_iota(jnp.int32, (1, tile_c), 1) + j * tile_c
    x = jnp.where(col < n_classes, x, _NEG_BIG)              # mask class padding

    onehot = col == t                                        # (TN, TC) bool
    xt_sc[...] += jnp.sum(jnp.where(onehot, x, 0.0), axis=-1, keepdims=True)

    m_prev = m_sc[...]
    m_new = jnp.maximum(m_prev, jnp.max(x, axis=-1, keepdims=True))
    s_sc[...] = (s_sc[...] * jnp.exp(m_prev - m_new)
                 + jnp.sum(jnp.exp(x - m_new), axis=-1, keepdims=True))
    m_sc[...] = m_new

    @pl.when(j == pl.num_programs(1) - 1)
    def _():
        lse = m_sc[...] + jnp.log(s_sc[...])
        logpb = jnp.minimum(xt_sc[...] - lse, 0.0)
        o_ref[...] = _focal_from_logpb(logpb, t, gamma=gamma, alpha=alpha,
                                       ignore_index=ignore_index)


def _vmem_budgets():
    """(block_budget_bytes, vmem_limit_bytes) derived from physical VMEM."""
    try:
        cap = int(pltpu.get_tpu_info().vmem_capacity_bytes)
    except Exception:
        cap = 64 * 1024 * 1024  # assume the smallest (v7x: 64 MiB per TensorCore)
    if cap <= 64 * 1024 * 1024:
        # v7x: leave >= ~24 MiB headroom for spills / internal scratch /
        # temporaries the block budget does not model.
        return 10 * 1024 * 1024, 40 * 1024 * 1024
    # v5e / v6e: 128 MiB physical.  The explicit limit is still required
    # (scoped defaults are only 16 / 32 MiB) for the large blocks to compile.
    return 24 * 1024 * 1024, 56 * 1024 * 1024


def _choose_tile_n(n_rows, block_lanes, itemsize, block_budget, *,
                   min_steps=8, min_block_bytes=2 * 1024 * 1024):
    """Largest row tile fitting the VMEM budget, while keeping >= min_steps
    grid steps (pipeline overlap; >= 4 per TC on v7x megacore) unless that
    would shrink the logits block below min_block_bytes (overhead regime)."""
    # Steady-state VMEM per block row:
    #   2x double-buffered input block
    # + ~3 f32 temporaries over the same lanes (upcast, exp(x-m), masked gather)
    # + double-buffered (row, 1) int32 target / f32 output columns (each
    #   lane-padded to 512 B per row).
    per_row = 2 * block_lanes * itemsize + 3 * block_lanes * 4 + 2 * (512 + 512)
    tile = max(8, block_budget // per_row)
    tile = min(tile, _round_up(max(n_rows, 1), 8))

    rows_for_min_steps = max(8, _round_up(-(-n_rows // min_steps), 8))
    min_rows_for_block = max(
        8, _round_up(-(-min_block_bytes // (block_lanes * itemsize)), 8))
    tile = min(tile, max(rows_for_min_steps, min_rows_for_block))

    return int(max(8, (tile // 8) * 8))


def softmax_focal_loss(logits, target, *, gamma=0.0, alpha=None,
                       ignore_index=-100, reduction='mean',
                       tile_n=None, tile_c=None, class_tile_threshold=4096,
                       vmem_limit_bytes=None):
    """JAX/Pallas equivalent of SoftmaxFocalLoss.forward(input_, target)."""
    if reduction not in ('mean', 'sum', 'none'):
        raise ValueError(f'Wrong value for reduction: {reduction}')

    C = logits.shape[-1]
    tgt_shape = target.shape
    x = logits.reshape(-1, C)                 # keep caller dtype (bf16 OK)
    t = target.reshape(-1).astype(jnp.int32)
    N = x.shape[0]
    itemsize = jnp.dtype(x.dtype).itemsize

    block_budget, default_limit = _vmem_budgets()
    if vmem_limit_bytes is None:
        vmem_limit_bytes = default_limit

    use_ctile = (tile_c is not None) or (C > class_tile_threshold)
    if use_ctile:
        if tile_c is None:
            tile_c = 2048
        tile_c = min(_round_up(int(tile_c), 128), _round_up(C, 128))
        c_pad = _round_up(C, tile_c)
        block_lanes = tile_c
    else:
        c_pad = C                              # block spans the full class dim
        block_lanes = _round_up(C, 128)        # VMEM lane padding of the block

    if tile_n is None:
        tile_n = _choose_tile_n(N, block_lanes, itemsize, block_budget)
    tile_n = max(8, (int(tile_n) // 8) * 8)

    # Pad rows to a multiple of tile_n; padded targets get ignore_index so the
    # kernel emits exactly zero loss for them.  Class padding (ctiled path
    # only) is masked inside the kernel, so the pad value is irrelevant.
    n_pad = _round_up(max(N, 1), tile_n)
    if n_pad != N or c_pad != C:
        x = jnp.pad(x, ((0, n_pad - N), (0, c_pad - C)))
        t = jnp.pad(t, (0, n_pad - N), constant_values=ignore_index)
    t2 = t.reshape(-1, 1)

    alpha_f = None if alpha is None else float(alpha)

    if use_ctile:
        kern = functools.partial(
            _focal_kernel_ctiled, gamma=float(gamma), alpha=alpha_f,
            ignore_index=int(ignore_index), n_classes=int(C),
            tile_c=int(tile_c))
        grid_spec = pltpu.PrefetchScalarGridSpec(
            num_scalar_prefetch=0,
            grid=(n_pad // tile_n, c_pad // tile_c),
            in_specs=[
                pl.BlockSpec((tile_n, tile_c), lambda i, j: (i, j)),  # logits
                pl.BlockSpec((tile_n, 1), lambda i, j: (i, 0)),       # targets
            ],
            out_specs=pl.BlockSpec((tile_n, 1), lambda i, j: (i, 0)),
            scratch_shapes=[pltpu.VMEM((tile_n, 1), jnp.float32)] * 3,
        )
        dim_sem = ("parallel", "arbitrary")
    else:
        kern = functools.partial(
            _focal_kernel, gamma=float(gamma), alpha=alpha_f,
            ignore_index=int(ignore_index))
        grid_spec = pltpu.PrefetchScalarGridSpec(
            num_scalar_prefetch=0,
            grid=(n_pad // tile_n,),
            in_specs=[
                pl.BlockSpec((tile_n, C), lambda i: (i, 0)),          # logits
                pl.BlockSpec((tile_n, 1), lambda i: (i, 0)),          # targets
            ],
            out_specs=pl.BlockSpec((tile_n, 1), lambda i: (i, 0)),
        )
        dim_sem = ("parallel",)

    per_elem = pl.pallas_call(
        kern,
        out_shape=jax.ShapeDtypeStruct((n_pad, 1), jnp.float32),
        grid_spec=grid_spec,
        compiler_params=pltpu.CompilerParams(
            dimension_semantics=dim_sem,
            vmem_limit_bytes=int(vmem_limit_bytes),
        ),
    )(x, t2)

    loss = per_elem[:N, 0].reshape(tgt_shape)  # reduction='none' result (f32)
    if reduction == 'mean':
        return loss.mean()                     # torch: mean over ALL elements
    if reduction == 'sum':
        return loss.sum()
    return loss


def _reference(logits, target, *, gamma, alpha, ignore_index, reduction):
    """Pure-JAX reference mirroring SoftmaxFocalLoss.forward."""
    logp = jax.nn.log_softmax(logits.astype(jnp.float32), axis=-1)
    valid = target != ignore_index
    t_safe = jnp.where(valid, target, 0)
    logpb = jnp.take_along_axis(logp, t_safe[..., None], axis=-1)[..., 0]
    pb = jnp.exp(logpb)
    loss = jnp.where(valid, -((1.0 - pb) ** gamma) * logpb, 0.0)
    if alpha is not None:
        loss = loss * jnp.where(target == 0, 1.0 - alpha, alpha)
    if reduction == 'mean':
        return loss.mean()
    if reduction == 'sum':
        return loss.sum()
    return loss


if __name__ == "__main__":
    key = jax.random.PRNGKey(0)
    k_logits, k_target, k_logits3, k_target3 = jax.random.split(key, 4)

    # Case 1: small class count (single row-grid axis), f32 logits, focal
    # gamma=2 + alpha weighting, 'mean' reduction.  batch=2, seq=17 exercises
    # row padding; classes=16 (class dim last, as the torch forward implies).
    B, S, C = 2, 17, 16
    logits = jax.random.normal(k_logits, (B, S, C), dtype=jnp.float32)
    target = jax.random.randint(k_target, (B, S), 0, C, dtype=jnp.int32)
    target = target.at[0, 0].set(-100).at[1, 5].set(-100)  # ignored positions

    out = softmax_focal_loss(logits, target, gamma=2.0, alpha=0.25,
                             ignore_index=-100, reduction='mean')
    ref = _reference(logits, target, gamma=2.0, alpha=0.25,
                     ignore_index=-100, reduction='mean')
    jax.block_until_ready(out)
    assert jnp.allclose(out, ref, rtol=1e-4, atol=1e-5), (out, ref)

    # Case 2: bf16 logits end-to-end, gamma=0 (plain-CE specialization),
    # no alpha, reduction='none'.
    out2 = softmax_focal_loss(logits.astype(jnp.bfloat16), target,
                              gamma=0.0, alpha=None,
                              ignore_index=-100, reduction='none')
    ref2 = _reference(logits.astype(jnp.bfloat16), target,
                      gamma=0.0, alpha=None,
                      ignore_index=-100, reduction='none')
    jax.block_until_ready(out2)
    assert jnp.allclose(out2, ref2, rtol=1e-4, atol=1e-5)

    # Case 3: class-tiled online-softmax path, forced at a small shape via
    # tile_c so it is actually exercised: C=300 split into 128-lane class
    # tiles (last tile partially padded), fractional gamma, 'sum' reduction.
    B3, S3, C3 = 2, 9, 300
    logits3 = jax.random.normal(k_logits3, (B3, S3, C3), dtype=jnp.float32)
    target3 = jax.random.randint(k_target3, (B3, S3), 0, C3, dtype=jnp.int32)
    target3 = target3.at[1, 0].set(-100)
    out3 = softmax_focal_loss(logits3, target3, gamma=1.5, alpha=0.25,
                              ignore_index=-100, reduction='sum', tile_c=128)
    ref3 = _reference(logits3, target3, gamma=1.5, alpha=0.25,
                      ignore_index=-100, reduction='sum')
    jax.block_until_ready(out3)
    assert jnp.allclose(out3, ref3, rtol=1e-4, atol=1e-4), (out3, ref3)

    print("KERNEL_OK")
</pallas_src>

<mosaic_0001>
module attributes {stable_mosaic.version = 11 : i64} {
  func.func @_focal_kernel(%arg0: i32, %arg1: memref<40x16xf32, #tpu.memory_space<vmem>>, %arg2: memref<40x1xi32, #tpu.memory_space<vmem>>, %arg3: memref<40x1xf32, #tpu.memory_space<vmem>>) attributes {dimension_semantics = [#tpu.dimension_semantics<parallel>], iteration_bounds = array<i64: 1>, scalar_prefetch = 0 : i64, scratch_operands = 0 : i64, tpu.core_type = #tpu.core_type<tc>, window_params = [{transform_indices = @transform_0, window_bounds = array<i64: 40, 16>}, {transform_indices = @transform_1, window_bounds = array<i64: 40, 1>}, {transform_indices = @transform_2, window_bounds = array<i64: 40, 1>}]} {
    %c0 = arith.constant 0 : index
    %c0_0 = arith.constant 0 : index
    %0 = vector.load %arg1[%c0, %c0_0] : memref<40x16xf32, #tpu.memory_space<vmem>>, vector<40x16xf32>
    %c0_1 = arith.constant 0 : index
    %c0_2 = arith.constant 0 : index
    %1 = vector.load %arg2[%c0_1, %c0_2] : memref<40x1xi32, #tpu.memory_space<vmem>>, vector<40x1xi32>
    %cst = arith.constant dense<0xFF800000> : vector<40xf32>
    %2 = vector.multi_reduction <maximumf>, %0, %cst [1] : vector<40x16xf32> to vector<40xf32>
    %3 = vector.shape_cast %2 : vector<40xf32> to vector<40x1xf32>
    %4 = vector.broadcast %3 : vector<40x1xf32> to vector<40x16xf32>
    %5 = arith.subf %0, %4 : vector<40x16xf32>
    %6 = math.exp %5 : vector<40x16xf32>
    %cst_3 = arith.constant dense<0.000000e+00> : vector<40xf32>
    %7 = vector.multi_reduction <add>, %6, %cst_3 [1] : vector<40x16xf32> to vector<40xf32>
    %8 = vector.shape_cast %7 : vector<40xf32> to vector<40x1xf32>
    %9 = math.log %8 : vector<40x1xf32>
    %10 = arith.addf %9, %3 : vector<40x1xf32>
    %11 = tpu.iota {dimensions = array<i32: 1>} : vector<1x16xi32>
    %12 = vector.broadcast %11 : vector<1x16xi32> to vector<40x16xi32>
    %13 = vector.broadcast %1 : vector<40x1xi32> to vector<40x16xi32>
    %14 = arith.cmpi eq, %12, %13 : vector<40x16xi32>
    %cst_4 = arith.constant 0.000000e+00 : f32
    %15 = vector.broadcast %cst_4 : f32 to vector<40x16xf32>
    %16 = arith.select %14, %0, %15 : vector<40x16xi1>, vector<40x16xf32>
    %cst_5 = arith.constant dense<0.000000e+00> : vector<40xf32>
    %17 = vector.multi_reduction <add>, %16, %cst_5 [1] : vector<40x16xf32> to vector<40xf32>
    %18 = vector.shape_cast %17 : vector<40xf32> to vector<40x1xf32>
    %19 = arith.subf %18, %10 : vector<40x1xf32>
    %cst_6 = arith.constant 0.000000e+00 : f32
    %20 = vector.broadcast %cst_6 : f32 to vector<40x1xf32>
    %21 = arith.minimumf %19, %20 : vector<40x1xf32>
    %22 = math.exp %21 : vector<40x1xf32>
    %cst_7 = arith.constant 1.000000e+00 : f32
    %23 = vector.broadcast %cst_7 : f32 to vector<40x1xf32>
    %24 = arith.subf %23, %22 : vector<40x1xf32>
    %25 = arith.mulf %24, %24 : vector<40x1xf32>
    %cst_8 = arith.constant 0.000000e+00 : f32
    %26 = vector.broadcast %cst_8 : f32 to vector<40x1xf32>
    %27 = arith.subf %26, %25 : vector<40x1xf32>
    %28 = arith.mulf %27, %21 : vector<40x1xf32>
    %c-100_i32 = arith.constant -100 : i32
    %29 = vector.broadcast %c-100_i32 : i32 to vector<40x1xi32>
    %30 = arith.cmpi ne, %1, %29 : vector<40x1xi32>
    %cst_9 = arith.constant 0.000000e+00 : f32
    %31 = vector.broadcast %cst_9 : f32 to vector<40x1xf32>
    %32 = arith.select %30, %28, %31 : vector<40x1xi1>, vector<40x1xf32>
    %c0_i32 = arith.constant 0 : i32
    %33 = vector.broadcast %c0_i32 : i32 to vector<40x1xi32>
    %34 = arith.cmpi eq, %1, %33 : vector<40x1xi32>
    %cst_10 = arith.constant 7.500000e-01 : f32
    %cst_11 = arith.constant 2.500000e-01 : f32
    %35 = vector.broadcast %cst_10 : f32 to vector<40x1xf32>
    %36 = vector.broadcast %cst_11 : f32 to vector<40x1xf32>
    %37 = arith.select %34, %35, %36 : vector<40x1xi1>, vector<40x1xf32>
    %38 = arith.mulf %32, %37 : vector<40x1xf32>
    %c0_12 = arith.constant 0 : index
    %c0_13 = arith.constant 0 : index
    %39 = vector.load %arg3[%c0_12, %c0_13] : memref<40x1xf32, #tpu.memory_space<vmem>>, vector<40x1xf32>
    tpu.vector_store %arg3[%c0_12, %c0_13], %38 {strides = array<i32>} : memref<40x1xf32, #tpu.memory_space<vmem>>, vector<40x1xf32>,
    return
  }
  func.func @transform_0(%arg0: i32) -> (i32, i32) {
    %c0_i32 = arith.constant 0 : i32
    %c0_i32_0 = arith.constant 0 : i32
    return %arg0, %c0_i32 : i32, i32
  }
  func.func @transform_1(%arg0: i32) -> (i32, i32) {
    %c0_i32 = arith.constant 0 : i32
    %c0_i32_0 = arith.constant 0 : i32
    return %arg0, %c0_i32 : i32, i32
  }
  func.func @transform_2(%arg0: i32) -> (i32, i32) {
    %c0_i32 = arith.constant 0 : i32
    %c0_i32_0 = arith.constant 0 : i32
    return %arg0, %c0_i32 : i32, i32
  }
}

</mosaic_0001>

<bundles_post_ra>
// kernel: tpu_custom_call.1
= control target key start
LH: loop header
LB: loop body
LE: loop exit
PB: predicated region body
PF: predicated region fallthrough
CT: control target
= control target key end

     0   :  { %vm21_vm0 = vcmask 130048   ;;  %v233_v3 = vmov 0   ;;  %v82_v31 = vlaneseq  ;;  %vm189_vm11 = vcmask 7168   ;;  %s384_s0 = inlined_call_operand.vmem [shape: f32[40,16], index: 0, kind: input, shape index: {}]   ;;  %s385_s1 = inlined_call_operand.vmem [shape: s32[40,1], index: 1, kind: input, shape index: {}]   ;;  %s386_s2 = inlined_call_operand.vmem [shape: f32[40,1], index: 2, kind: output, shape index: {}]  }
   0x1   :  { %v253_v0 = vld [vmem:[%s384_s0] sm:$0xff]  ;;  %v258_v1 = vld [vmem:[%s384_s0 + $0x10] sm:$0xff]  ;;  %v12_v2 = vld [vmem:[%s384_s0 + $0x8] sm:$0xff]  ;;  %201 = vset.pattern.permute.xlu1 %v233_v3  ;;  %202 = vset.pattern.permute.xlu0 %v233_v3 }
   0x2   :  { %v22_v4 = vsel %vm21_vm0, %v253_v0, -inf  ;;  %v28_v5 = vsel %vm21_vm0, %v258_v1, -inf  ;;  %v270_v6 = vld [vmem:[%s384_s0 + $0x18] sm:$0xff]  ;;  %v25_v7 = vsel %vm21_vm0, %v12_v2, -inf  ;;  %v278_v9 = vld [vmem:[%s384_s0 + $0x20] sm:$0xff]  ;;  %v291_v12 = vld [vmem:[%s385_s1 + $0x10] sm:$0xff] }
   0x3   :  { %23 = vmax.xlane.f32.xlu0 %v22_v4  ;;  %29 = vmax.xlane.f32.xlu1 %v28_v5  ;;  %v31_v8 = vsel %vm21_vm0, %v270_v6, -inf  ;;  %v34_v10 = vsel %vm21_vm0, %v278_v9, -inf  ;;  %v285_v11 = vld [vmem:[%s385_s1] sm:$0xff]  ;;  %v297_v13 = vld [vmem:[%s385_s1 + $0x18] sm:$0xff]  ;;  %v302_v14 = vld [vmem:[%s385_s1 + $0x8] sm:$0xff]  ;;  %v83_v33 = vand.u32 127, %v82_v31 }
   0x4   :  { %v309_v15 = vld [vmem:[%s385_s1 + $0x20] sm:$0xff]  ;;  %vm174_vm6 = vcmp.eq.s32.totalorder %v285_v11, 0  ;;  %vm164_vm7 = vcmp.ne.s32.totalorder %v285_v11, 4294967196  ;;  %vm176_vm8 = vcmp.eq.s32.totalorder %v291_v12, 0  ;;  %vm175_vm9 = vcmp.eq.s32.totalorder %v302_v14, 0 }
   0x5   :  { %vm177_vm10 = vcmp.eq.s32.totalorder %v297_v13, 0  ;;  %vm165_vm12 = vcmp.ne.s32.totalorder %v302_v14, 4294967196  ;;  %vm166_vm13 = vcmp.ne.s32.totalorder %v291_v12, 4294967196  ;;  %vm167_vm14 = vcmp.ne.s32.totalorder %v297_v13, 4294967196 }
   0x6   :  { %vm178_vm15 = vcmp.eq.s32.totalorder %v309_v15, 0 }
   0x7   :  { %26 = vmax.xlane.f32.xlu0 %v25_v7  ;;  %32 = vmax.xlane.f32.xlu1 %v31_v8 }
   0xb   :  { %35 = vmax.xlane.f32.xlu0 %v34_v10 }
  0x18   :  { %85 = vperm.xlu1 %201, %v285_v11  }
  0x1c   :  { %91 = vperm.xlu1 %201, %v291_v12  }
  0x20   :  { %94 = vperm.xlu1 %201, %v297_v13  }
  0x21   :  { %88 = vperm.xlu0 %202, %v302_v14  }
  0x24   :  { %97 = vperm.xlu1 %201, %v309_v15  }
  0x90   :  { %v312_v16 = vpop.xlane.xlu0 %23  ;;  %v314_v17 = vpop.xlane.xlu1 %29 }
  0x91   :  { %v37_v18 = vsub.f32 %v253_v0, %v312_v16  ;;  %v39_v19 = vsub.f32 %v258_v1, %v314_v17 }
  0x93   :  { %v42_v20 = vmul.f32 1.442695, %v37_v18  ;;  %v46_v21 = vmul.f32 1.442695, %v39_v19 }
  0x94   :  { %v320_v22 = vpop.xlane.xlu0 %26  ;;  %v322_v23 = vpop.xlane.xlu1 %32 }
  0x95   :  { %203 = vpow2.f32 %v42_v20  ;;  %v38_v24 = vsub.f32 %v12_v2, %v320_v22  ;;  %v40_v25 = vsub.f32 %v270_v6, %v322_v23 }
  0x96   :  { %205 = vpow2.f32 %v46_v21 }
  0x97   :  { %v44_v26 = vmul.f32 1.442695, %v38_v24  ;;  %v48_v27 = vmul.f32 1.442695, %v40_v25 }
  0x98   :  { %v327_v28 = vpop.xlane.xlu0 %35  ;;  %v86_v29 = vpop.permute.xlu1 %85 }
  0x99   :  { %207 = vpow2.f32 %v44_v26  ;;  %v41_v30 = vsub.f32 %v278_v9, %v327_v28  ;;  %vm99_vm3 = vcmp.eq.s32.totalorder %v83_v33, %v86_v29 }
  0x9a   :  { %209 = vpow2.f32 %v48_v27  ;;  %v104_v51 = vsel %vm99_vm3, %v253_v0, 0.0 }
  0x9b   :  { %v50_v32 = vmul.f32 1.442695, %v41_v30  ;;  %v109_v52 = vsel %vm21_vm0, %v104_v51, 0.0 }
  0x9c   :  { %v92_v34 = vpop.permute.xlu1 %91 }
  0x9d   :  { %211 = vpow2.f32 %v50_v32  ;;  %vm101_vm4 = vcmp.eq.s32.totalorder %v83_v33, %v92_v34 }
  0x9e   :  { %v106_v54 = vsel %vm101_vm4, %v258_v1, 0.0 }
  0x9f   :  { %v204_v35 = vpop.eup %203  ;;  %v115_v55 = vsel %vm21_vm0, %v106_v54, 0.0 }
  0xa0   :  { %v206_v36 = vpop.eup %205  ;;  %v52_v37 = vsel %vm21_vm0, %v204_v35, 0.0  ;;  %v89_v38 = vpop.permute.xlu0 %88 }
  0xa1   :  { %53 = vadd.xlane.f32.xlu1 %v52_v37  ;;  %vm100_vm1 = vcmp.eq.s32.totalorder %v83_v33, %v89_v38  ;;  %v58_v39 = vsel %vm21_vm0, %v206_v36, 0.0  ;;  %v95_v41 = vpop.permute.xlu1 %94 }
  0xa2   :  { %v105_v42 = vsel %vm100_vm1, %v12_v2, 0.0  ;;  %vm102_vm2 = vcmp.eq.s32.totalorder %v83_v33, %v95_v41 }
  0xa3   :  { %v208_v40 = vpop.eup %207  ;;  %v112_v46 = vsel %vm21_vm0, %v105_v42, 0.0  ;;  %v107_v48 = vsel %vm102_vm2, %v270_v6, 0.0 }
  0xa4   :  { %v210_v43 = vpop.eup %209  ;;  %v55_v44 = vsel %vm21_vm0, %v208_v40, 0.0  ;;  %v118_v50 = vsel %vm21_vm0, %v107_v48, 0.0  ;;  %v234_v48 = vmov 0.25  }
  0xa5   :  { %59 = vadd.xlane.f32.xlu1 %v58_v39  ;;  %56 = vadd.xlane.f32.xlu0 %v55_v44  ;;  %v61_v45 = vsel %vm21_vm0, %v210_v43, 0.0  ;;  %v98_v53 = vpop.permute.xlu1 %97  ;;  %v182_v14 = vsel %vm177_vm10, 0.75, %v234_v48  ;;  %v183_v13 = vsel %vm178_vm15, 0.75, %v234_v48 }
  0xa6   :  { %vm103_vm5 = vcmp.eq.s32.totalorder %v83_v33, %v98_v53 }
  0xa7   :  { %v212_v47 = vpop.eup %211  ;;  %v108_v56 = vsel %vm103_vm5, %v278_v9, 0.0 }
  0xa8   :  { %v64_v49 = vsel %vm21_vm0, %v212_v47, 0.0  ;;  %v121_v57 = vsel %vm21_vm0, %v108_v56, 0.0  ;;  %vm168_vm0 = vcmp.ne.s32.totalorder %v309_v15, 4294967196 }
  0xa9   :  { %62 = vadd.xlane.f32.xlu1 %v61_v45  ;;  %113 = vadd.xlane.f32.xlu0 %v112_v46 }
  0xad   :  { %65 = vadd.xlane.f32.xlu1 %v64_v49  ;;  %119 = vadd.xlane.f32.xlu0 %v118_v50  ;;  %v179_v49 = vsel %vm174_vm6, 0.75, %v234_v48 }
  0xb1   :  { %110 = vadd.xlane.f32.xlu1 %v109_v52 }
  0xb5   :  { %116 = vadd.xlane.f32.xlu1 %v115_v55 }
  0xb9   :  { %122 = vadd.xlane.f32.xlu1 %v121_v57 }
 0x12e   :  { %v54_v58 = vpop.xlane.xlu1 %53 }
 0x12f   :  { %213 = vlog2.f32 %v54_v58 }
 0x132   :  { %v60_v59 = vpop.xlane.xlu1 %59  ;;  %v57_v60 = vpop.xlane.xlu0 %56 }
 0x133   :  { %215 = vlog2.f32 %v60_v59  ;;  %v180_v59 = vsel %vm175_vm9, 0.75, %v234_v48 }
 0x134   :  { %217 = vlog2.f32 %v57_v60 }
 0x136   :  { %v63_v61 = vpop.xlane.xlu1 %62  ;;  %v114_v7 = vpop.xlane.xlu0 %113 }
 0x137   :  { %219 = vlog2.f32 %v63_v61  ;;  %v181_v61 = vsel %vm176_vm8, 0.75, %v234_v48 }
 0x139   :  { %v214_v62 = vpop.eup %213 }
 0x13a   :  { %v68_v63 = vmul.f32 0.6931472, %v214_v62  ;;  %v66_v0 = vpop.xlane.xlu1 %65  ;;  %v120_v30 = vpop.xlane.xlu0 %119 }
 0x13b   :  { %221 = vlog2.f32 %v66_v0 }
 0x13c   :  { %v77_v1 = vadd.f32 %v68_v63, %v312_v16 }
 0x13d   :  { %v216_v2 = vpop.eup %215 }
 0x13e   :  { %v218_v3 = vpop.eup %217  ;;  %v72_v4 = vmul.f32 0.6931472, %v216_v2  ;;  %v111_v5 = vpop.xlane.xlu1 %110 }
 0x13f   :  { %v70_v6 = vmul.f32 0.6931472, %v218_v3  ;;  %v124_v8 = vsub.f32 %v111_v5, %v77_v1 }
 0x140   :  { %v79_v9 = vadd.f32 %v72_v4, %v314_v17 }
 0x141   :  { %v220_v10 = vpop.eup %219  ;;  %v78_v18 = vadd.f32 %v70_v6, %v320_v22  ;;  %v129_v19 = vmin.f32 %v124_v8, 0.0 }
 0x142   :  { %v74_v20 = vmul.f32 0.6931472, %v220_v10  ;;  %v117_v21 = vpop.xlane.xlu1 %116 }
 0x143   :  { %v125_v24 = vsub.f32 %v114_v7, %v78_v18  ;;  %v134_v25 = vmul.f32 1.442695, %v129_v19  ;;  %v126_v26 = vsub.f32 %v117_v21, %v79_v9 }
 0x144   :  { %v80_v16 = vadd.f32 %v74_v20, %v322_v23 }
 0x145   :  { %v222_v27 = vpop.eup %221  ;;  %v130_v29 = vmin.f32 %v125_v24, 0.0  ;;  %223 = vpow2.f32 %v134_v25  ;;  %v131_v31 = vmin.f32 %v126_v26, 0.0 }
 0x146   :  { %v76_v32 = vmul.f32 0.6931472, %v222_v27  ;;  %v127_v33 = vsub.f32 %v120_v30, %v80_v16  ;;  %v123_v36 = vpop.xlane.xlu1 %122 }
 0x147   :  { %v136_v34 = vmul.f32 1.442695, %v130_v29  ;;  %v138_v17 = vmul.f32 1.442695, %v131_v31 }
 0x148   :  { %v132_v35 = vmin.f32 %v127_v33, 0.0  ;;  %v81_v22 = vadd.f32 %v76_v32, %v327_v28 }
 0x149   :  { %225 = vpow2.f32 %v136_v34 }
 0x14a   :  { %v140_v37 = vmul.f32 1.442695, %v132_v35  ;;  %227 = vpow2.f32 %v138_v17  ;;  %v128_v38 = vsub.f32 %v123_v36, %v81_v22 }
 0x14c   :  { %229 = vpow2.f32 %v140_v37  ;;  %v133_v39 = vmin.f32 %v128_v38, 0.0 }
 0x14e   :  { %v142_v23 = vmul.f32 1.442695, %v133_v39 }
 0x14f   :  { %v224_v40 = vpop.eup %223 }
 0x150   :  { %v144_v41 = vsub.f32 1.0, %v224_v40  ;;  %231 = vpow2.f32 %v142_v23 }
 0x152   :  { %v149_v42 = vmul.f32 %v144_v41, %v144_v41 }
 0x153   :  { %v226_v43 = vpop.eup %225 }
 0x154   :  { %v228_v44 = vpop.eup %227  ;;  %v145_v45 = vsub.f32 1.0, %v226_v43  ;;  %v154_v46 = vsub.f32 0.0, %v149_v42 }
 0x155   :  { %v146_v28 = vsub.f32 1.0, %v228_v44 }
 0x156   :  { %v230_v47 = vpop.eup %229  ;;  %v150_v50 = vmul.f32 %v145_v45, %v145_v45  ;;  %v159_v51 = vmul.f32 %v154_v46, %v129_v19 }
 0x157   :  { %v147_v52 = vsub.f32 1.0, %v230_v47  ;;  %v151_v53 = vmul.f32 %v146_v28, %v146_v28 }
 0x158   :  { %v155_v54 = vsub.f32 0.0, %v150_v50  ;;  %v169_v55 = vsel %vm164_vm7, %v159_v51, 0.0 }
 0x159   :  { %v152_v11 = vmul.f32 %v147_v52, %v147_v52  ;;  %v184_v56 = vmul.f32 %v179_v49, %v169_v55  ;;  %v156_v57 = vsub.f32 0.0, %v151_v53 }
 0x15a   :  { %v232_v58 = vpop.eup %231  ;;  %v160_v60 = vmul.f32 %v155_v54, %v130_v29 }
 0x15b   :  { %v157_v62 = vsub.f32 0.0, %v152_v11  ;;  %190 = vst.msk [vmem:[%s386_s2] sm:$0xff] %vm189_vm11, %v184_v56  ;;  %v161_v63 = vmul.f32 %v156_v57, %v131_v31  ;;  %v148_v0 = vsub.f32 1.0, %v232_v58 }
 0x15c   :  { %v170_v1 = vsel %vm165_vm12, %v160_v60, 0.0 }
 0x15d   :  { %v185_v2 = vmul.f32 %v180_v59, %v170_v1  ;;  %v162_v3 = vmul.f32 %v157_v62, %v132_v35  ;;  %v171_v4 = vsel %vm166_vm13, %v161_v63, 0.0  ;;  %v153_v5 = vmul.f32 %v148_v0, %v148_v0 }
 0x15e   :  { %v186_v12 = vmul.f32 %v181_v61, %v171_v4 }
 0x15f   :  { %191 = vst.msk [vmem:[%s386_s2 + $0x8] sm:$0xff] %vm189_vm11, %v185_v2  ;;  %v172_v6 = vsel %vm167_vm14, %v162_v3, 0.0  ;;  %v158_v7 = vsub.f32 0.0, %v153_v5 }
 0x160   :  { %v187_v8 = vmul.f32 %v182_v14, %v172_v6  ;;  %192 = vst.msk [vmem:[%s386_s2 + $0x10] sm:$0xff] %vm189_vm11, %v186_v12 }
 0x161   :  { %v163_v9 = vmul.f32 %v158_v7, %v133_v39 }
 0x162   :  { %193 = vst.msk [vmem:[%s386_s2 + $0x18] sm:$0xff] %vm189_vm11, %v187_v8 }
 0x163   :  { %v173_v10 = vsel %vm168_vm0, %v163_v9, 0.0 }
 0x164   :  { %v188_v18 = vmul.f32 %v183_v13, %v173_v10 }
 0x166   :  { %194 = vst.msk [vmem:[%s386_s2 + $0x20] sm:$0xff] %vm189_vm11, %v188_v18 }

</bundles_post_ra>
